<compile_context>
chip_gen: v5e
topology: v5e:2x2
jax: 0.10.0
libtpu: 0.0.40
codegen_flags: <defaults>
</compile_context>

<pallas_src>
import functools
import numpy as np

import jax
import jax.numpy as jnp
from jax import lax
from jax.experimental import pallas as pl
from jax.experimental.pallas import tpu as pltpu

try:  # host-side solver (same as the PyTorch reference path)
    from scipy.optimize import linear_sum_assignment as _scipy_lsa
except Exception:  # pragma: no cover
    _scipy_lsa = None


def _round_up(x, m):
    return ((x + m - 1) // m) * m


def _cdiv(a, b):
    return -(-a // b)


def _device_kind():
    try:
        return jax.devices()[0].device_kind.lower()
    except Exception:
        return ""


def _vmem_capacity_bytes():
    try:
        return int(pltpu.get_tpu_info().vmem_capacity_bytes)
    except Exception:
        pass
    kind = _device_kind()
    if "7" in kind:                       # v7x: 64 MiB per TensorCore
        return 64 * 1024 * 1024
    return 128 * 1024 * 1024              # v5e / v6e


def _device_generation():
    kind = _device_kind()
    for g in (7, 6, 5, 4, 3, 2):
        if str(g) in kind:
            return g
    return 0


# ----------------------------------------------------------------------------
# Pallas kernel: batched cost matrices with HW-tiled reduction
# ----------------------------------------------------------------------------
def _cost_kernel(logits_ref, onehot_ref, pmask_ref, tmask_ref, out_ref, pt_acc,
                 *, w_class, w_mask, w_dice, hw, n_slot, t_slot, sigmoid_bf16):
    # logits_ref : (N_rows, C)       f32   pred class logits (raw, no softmax)
    # onehot_ref : (T_pad, C)        f32   one-hot gt labels (pad rows = 0)
    # pmask_ref  : (N_rows, hw_tile) bf16  pred mask logits; rows >= N are +1e4
    #                                      (sigmoid==1) so their pt row == sum_t
    # tmask_ref  : (T_pad, hw_tile)  int8  gt masks 0/1; row t_slot is all-ones
    #                                      over real pixels so its pt col == sum_p
    # out_ref    : (N_rows, T_pad)   f32   cost matrix
    # pt_acc     : (N_rows, T_pad)   f32   p @ t^T accumulator
    k = pl.program_id(1)

    @pl.when(k == 0)
    def _init():
        pt_acc[...] = jnp.zeros_like(pt_acc)

    dn = (((1,), (1,)), ((), ()))   # contract the shared last (lane) axis

    if sigmoid_bf16:
        # v7x: bf16 EUP sigmoid (kernel may be compute-bound at 3.2 TB/s HBM).
        p_bf = jax.nn.sigmoid(pmask_ref[...])
    else:
        # v5e/v6e: f32 sigmoid (fully hidden under DMA), bf16 into the MXU.
        p_bf = jax.nn.sigmoid(pmask_ref[...].astype(jnp.float32)).astype(jnp.bfloat16)
    t_bf = tmask_ref[...].astype(jnp.bfloat16)     # int8 -> bf16 (exact 0/1)

    pt_acc[...] += lax.dot_general(p_bf, t_bf, dn,
                                   preferred_element_type=jnp.float32)

    @pl.when(k == pl.num_programs(1) - 1)
    def _finalize():
        pt = pt_acc[...]                          # (N_rows, T_pad)
        sp = pt[:, t_slot:t_slot + 1]             # sum_p  (N_rows, 1)
        st = pt[n_slot:n_slot + 1, :]             # sum_t  (1, T_pad)

        # mask cost: -(p@t^T + (1-p)@(1-t)^T)/HW, with the second matmul
        # replaced by HW - sum_p - sum_t + p@t^T (exact: pad pixels have t==0).
        cost_mask = -(2.0 * pt - sp - st + hw) * (1.0 / hw)

        # dice cost: 1 - (2*pt + 1) / (sum_p + sum_t + 1)
        cost_dice = 1.0 - (2.0 * pt + 1.0) / (sp + st + 1.0)

        # class cost: -logits[:, labels] via one-hot matmul (raw logits).
        cost_class = -lax.dot_general(logits_ref[...], onehot_ref[...], dn,
                                      preferred_element_type=jnp.float32)

        out_ref[...] = (w_class * cost_class
                        + w_mask * cost_mask
                        + w_dice * cost_dice)


def _choose_hw_tile(n_rows, t_rows, hw, *, sigmoid_bf16, vmem_limit_bytes):
    """Smallest number of reduction steps K whose per-step VMEM footprint fits
    the budget; hw_tile = ceil(ceil(HW/128)/K)*128 so over-padding < 128*K."""
    hw_chunks = _round_up(hw, 128) // 128
    # VMEM bytes per 128-wide column chunk:
    #   pmask: 2 double-buffered bf16 blocks (+ in-body sigmoid/cast temporaries)
    #   tmask: 2 double-buffered int8 blocks  + in-body bf16 upcast
    p_bytes = n_rows * (2 * 2 + (2 if sigmoid_bf16 else 6))
    t_bytes = t_rows * (2 * 1 + 2)
    per_chunk = (p_bytes + t_bytes) * 128
    fixed = (3 * n_rows * t_rows * 4            # pt acc + double-buffered output
             + (n_rows + t_rows) * 4 * 1024)    # logits/onehot blocks + slack
    budget = int(vmem_limit_bytes * 0.6) - fixed
    max_chunks = max(1, budget // per_chunk)
    k = max(1, _cdiv(hw_chunks, max_chunks))
    tile_chunks = _cdiv(hw_chunks, k)
    return tile_chunks * 128, k * tile_chunks * 128


def _batched_cost_matrices(logits, onehot, pmask, tmask, *, hw, hw_tile,
                           n_slot, t_slot, w_class, w_mask, w_dice,
                           sigmoid_bf16, vmem_limit_bytes):
    B, N_rows, C = logits.shape
    _, T_pad, _ = onehot.shape
    _, _, HW_pad = pmask.shape
    assert HW_pad % hw_tile == 0
    K = HW_pad // hw_tile

    kernel = functools.partial(
        _cost_kernel,
        w_class=float(w_class), w_mask=float(w_mask), w_dice=float(w_dice),
        hw=float(hw), n_slot=int(n_slot), t_slot=int(t_slot),
        sigmoid_bf16=bool(sigmoid_bf16))

    grid_spec = pltpu.PrefetchScalarGridSpec(
        num_scalar_prefetch=0,
        grid=(B, K),
        in_specs=[
            pl.BlockSpec((None, N_rows, C), lambda b, k: (b, 0, 0)),
            pl.BlockSpec((None, T_pad, C), lambda b, k: (b, 0, 0)),
            pl.BlockSpec((None, N_rows, hw_tile), lambda b, k: (b, 0, k)),
            pl.BlockSpec((None, T_pad, hw_tile), lambda b, k: (b, 0, k)),
        ],
        out_specs=pl.BlockSpec((None, N_rows, T_pad), lambda b, k: (b, 0, 0)),
        scratch_shapes=[
            pltpu.VMEM((N_rows, T_pad), jnp.float32),   # pt accumulator
        ],
    )
    return pl.pallas_call(
        kernel,
        out_shape=jax.ShapeDtypeStruct((B, N_rows, T_pad), jnp.float32),
        grid_spec=grid_spec,
        compiler_params=pltpu.CompilerParams(
            dimension_semantics=("parallel", "arbitrary"),
            vmem_limit_bytes=int(vmem_limit_bytes)),
    )(logits.astype(jnp.float32), onehot.astype(jnp.float32),
      pmask.astype(jnp.bfloat16), tmask.astype(jnp.int8))


# ----------------------------------------------------------------------------
# Host-side Hungarian algorithm (fallback == scipy.optimize.linear_sum_assignment)
# ----------------------------------------------------------------------------
def _lsa_python(cost):
    cost = np.asarray(cost, dtype=np.float64)
    transposed = False
    if cost.shape[0] > cost.shape[1]:
        cost = cost.T
        transposed = True
    n, m = cost.shape  # n <= m
    INF = float("inf")
    u = np.zeros(n + 1)
    v = np.zeros(m + 1)
    p = np.zeros(m + 1, dtype=np.int64)
    way = np.zeros(m + 1, dtype=np.int64)
    for i in range(1, n + 1):
        p[0] = i
        j0 = 0
        minv = np.full(m + 1, INF)
        used = np.zeros(m + 1, dtype=bool)
        while True:
            used[j0] = True
            i0 = p[j0]
            delta = INF
            j1 = 0
            for j in range(1, m + 1):
                if not used[j]:
                    cur = cost[i0 - 1, j - 1] - u[i0] - v[j]
                    if cur < minv[j]:
                        minv[j] = cur
                        way[j] = j0
                    if minv[j] < delta:
                        delta = minv[j]
                        j1 = j
            for j in range(m + 1):
                if used[j]:
                    u[p[j]] += delta
                    v[j] -= delta
                else:
                    minv[j] -= delta
            j0 = j1
            if p[j0] == 0:
                break
        while True:
            j1 = way[j0]
            p[j0] = p[j1]
            j0 = j1
            if j0 == 0:
                break
    rows, cols = [], []
    for j in range(1, m + 1):
        if p[j] != 0:
            rows.append(p[j] - 1)
            cols.append(j - 1)
    rows = np.asarray(rows, dtype=np.int64)
    cols = np.asarray(cols, dtype=np.int64)
    if transposed:
        rows, cols = cols, rows
    order = np.argsort(rows, kind="stable")
    return rows[order], cols[order]


def _linear_sum_assignment(cost):
    if _scipy_lsa is not None:
        r, c = _scipy_lsa(np.asarray(cost, dtype=np.float64))
        return np.asarray(r, dtype=np.int64), np.asarray(c, dtype=np.int64)
    return _lsa_python(cost)


# ----------------------------------------------------------------------------
# Module-equivalent wrapper
# ----------------------------------------------------------------------------
class HungarianAssigner:
    def __init__(self, match_cost_class=1, match_cost_mask=1, match_cost_dice=1):
        self.match_cost_class = match_cost_class
        self.match_cost_mask = match_cost_mask
        self.match_cost_dice = match_cost_dice

    def compute_cost_matrices(self, pred_logits, pred_masks, gt_labels, gt_masks):
        """Returns (C_all: (B, N_rows, T_pad) f32 device array, N, t_counts)."""
        pred_logits = jnp.asarray(pred_logits)
        pred_masks = jnp.asarray(pred_masks)
        B, N, C = pred_logits.shape
        H, W = pred_masks.shape[-2:]
        # TODO(synk): F.interpolate(bilinear) path when pred/gt spatial sizes
        # differ is not implemented; sizes are assumed to already match.
        HW = H * W

        t_counts = [int(np.shape(l)[0]) for l in gt_labels]
        T_max = max(t_counts) if t_counts else 0
        t_slot = T_max                              # extra all-ones GT column -> sum_p
        T_pad = _round_up(T_max + 1, 128)           # lane-dense output columns
        n_slot = N                                  # extra +1e4 pred row     -> sum_t
        N_rows = _round_up(N + 1, 16)               # bf16 sublane packing (16 rows)

        gen = _device_generation()
        sigmoid_bf16 = gen >= 7                     # bf16 EUP path only on v7x
        vmem_cap = _vmem_capacity_bytes()
        vmem_limit = int(vmem_cap * 0.75)           # ~96 MiB on v5e/v6e, ~48 MiB on v7x
        hw_tile, HW_pad = _choose_hw_tile(
            N_rows, T_pad, HW, sigmoid_bf16=sigmoid_bf16,
            vmem_limit_bytes=vmem_limit)

        # Pred streams (device-side padding; pad HW columns are zeros — they
        # never matter because the GT masks are zero there; pad rows are +1e4
        # so sigmoid==1 and their pt row accumulates sum_t exactly).
        logits_pad = jnp.pad(pred_logits.astype(jnp.float32),
                             ((0, 0), (0, N_rows - N), (0, 0)))
        pm = pred_masks.reshape(B, N, HW).astype(jnp.bfloat16)
        pm = jnp.pad(pm, ((0, 0), (0, 0), (0, HW_pad - HW)))
        ones_rows = jnp.full((B, N_rows - N, HW_pad), 1e4, dtype=jnp.bfloat16)
        pmask_pad = jnp.concatenate([pm, ones_rows], axis=1)

        # GT streams: host staging as int8 (assumes binary 0/1 GT masks, as in
        # segmentation GT) — 4x smaller H2D transfer and HBM stream.
        tmask_np = np.zeros((B, T_pad, HW_pad), dtype=np.int8)
        onehot_np = np.zeros((B, T_pad, C), dtype=np.float32)
        for i in range(B):
            ti = t_counts[i]
            tmask_np[i, t_slot, :HW] = 1            # all-ones col over real pixels
            if ti == 0:
                continue
            tm = np.asarray(jax.device_get(gt_masks[i]))
            tmask_np[i, :ti, :HW] = (tm.reshape(ti, -1)[:, :HW] > 0.5).astype(np.int8)
            lab = np.asarray(jax.device_get(gt_labels[i])).astype(np.int64).reshape(-1)
            valid = (lab >= 0) & (lab < C)
            onehot_np[i, np.arange(ti)[valid], lab[valid]] = 1.0
        tmask_pad = jnp.asarray(tmask_np)
        onehot_pad = jnp.asarray(onehot_np)

        C_all = _batched_cost_matrices(
            logits_pad, onehot_pad, pmask_pad, tmask_pad,
            hw=HW, hw_tile=hw_tile, n_slot=n_slot, t_slot=t_slot,
            w_class=self.match_cost_class,
            w_mask=self.match_cost_mask,
            w_dice=self.match_cost_dice,
            sigmoid_bf16=sigmoid_bf16,
            vmem_limit_bytes=vmem_limit)
        return C_all, N, t_counts

    def __call__(self, pred_logits, pred_masks, gt_labels, gt_masks):
        C_all, N, t_counts = self.compute_cost_matrices(
            pred_logits, pred_masks, gt_labels, gt_masks)
        # Single device->host transfer for the whole batch, then host Hungarian.
        C_host = np.asarray(jax.device_get(C_all), dtype=np.float64)
        indices = []
        for i, ti in enumerate(t_counts):
            if ti == 0:
                indices.append((np.zeros((0,), np.int64), np.zeros((0,), np.int64)))
                continue
            pred_ids, gt_ids = _linear_sum_assignment(C_host[i, :N, :ti])
            indices.append((np.asarray(pred_ids, dtype=np.int64),
                            np.asarray(gt_ids, dtype=np.int64)))
        return indices


# ----------------------------------------------------------------------------
# Pure-numpy reference (sanity check of the kernel's cost matrix)
# ----------------------------------------------------------------------------
def _cost_matrix_ref(p_logits, p_masks_flat, t_labels, t_masks_flat, wc, wm, wd):
    p_logits = np.asarray(p_logits, np.float64)
    p = 1.0 / (1.0 + np.exp(-np.asarray(p_masks_flat, np.float64)))
    t = np.asarray(t_masks_flat, np.float64)
    hw = p.shape[1]
    cost_class = -p_logits[:, np.asarray(t_labels)]
    cost_mask = (-(p @ t.T) - ((1.0 - p) @ (1.0 - t).T)) / hw
    num = 2.0 * (p @ t.T)
    den = p.sum(-1, keepdims=True) + t.sum(-1, keepdims=True).T
    cost_dice = 1.0 - (num + 1.0) / (den + 1.0)
    return wc * cost_class + wm * cost_mask + wd * cost_dice


if __name__ == "__main__":
    key = jax.random.PRNGKey(0)
    B, N, C, H, W = 2, 8, 4, 16, 16
    gt_counts = [3, 5]

    k1, k2, k3 = jax.random.split(key, 3)
    pred_logits = jax.random.normal(k1, (B, N, C), dtype=jnp.float32)
    pred_masks = jax.random.normal(k2, (B, N, H, W), dtype=jnp.float32)

    gt_labels, gt_masks = [], []
    for i, T in enumerate(gt_counts):
        kl, km = jax.random.split(jax.random.fold_in(k3, i))
        gt_labels.append(jax.random.randint(kl, (T,), 0, C, dtype=jnp.int32))
        gt_masks.append(
            (jax.random.uniform(km, (T, H, W)) > 0.5).astype(jnp.float32))

    assigner = HungarianAssigner(match_cost_class=1, match_cost_mask=1,
                                 match_cost_dice=1)

    # Run the batched Pallas kernel once and block on it.
    C_all, N_real, t_counts = assigner.compute_cost_matrices(
        pred_logits, pred_masks, gt_labels, gt_masks)
    jax.block_until_ready(C_all)
    C_host = np.asarray(jax.device_get(C_all))

    # Sanity check vs numpy f64 reference (bf16 mask path -> loose tolerance).
    for i in range(B):
        ref = _cost_matrix_ref(
            pred_logits[i],
            np.asarray(pred_masks[i]).reshape(N, H * W),
            np.asarray(gt_labels[i]),
            np.asarray(gt_masks[i]).reshape(gt_counts[i], H * W),
            1.0, 1.0, 1.0)
        np.testing.assert_allclose(C_host[i, :N, :gt_counts[i]], ref,
                                   rtol=2e-2, atol=2e-2)

    # Full assigner forward (Pallas cost tensor + host Hungarian).
    indices = assigner(pred_logits, pred_masks, gt_labels, gt_masks)
    assert len(indices) == B
    for (pred_ids, gt_ids), T in zip(indices, gt_counts):
        assert pred_ids.shape == (T,) and gt_ids.shape == (T,)
        assert pred_ids.dtype == np.int64 and gt_ids.dtype == np.int64
        assert len(set(pred_ids.tolist())) == T and len(set(gt_ids.tolist())) == T

    print("KERNEL_OK")
</pallas_src>

<mosaic_0001>
module attributes {stable_mosaic.version = 11 : i64} {
  func.func @_cost_kernel(%arg0: i32, %arg1: i32, %arg2: memref<1x16x4xf32, #tpu.memory_space<vmem>>, %arg3: memref<1x128x4xf32, #tpu.memory_space<vmem>>, %arg4: memref<1x16x256xbf16, #tpu.memory_space<vmem>>, %arg5: memref<1x128x256xi8, #tpu.memory_space<vmem>>, %arg6: memref<1x16x128xf32, #tpu.memory_space<vmem>>, %arg7: memref<16x128xf32, #tpu.memory_space<vmem>>) attributes {dimension_semantics = [#tpu.dimension_semantics<parallel>, #tpu.dimension_semantics<arbitrary>], iteration_bounds = array<i64: 2, 1>, scalar_prefetch = 0 : i64, scratch_operands = 1 : i64, tpu.core_type = #tpu.core_type<tc>, window_params = [{transform_indices = @transform_0, window_bounds = array<i64: 1, 16, 4>}, {transform_indices = @transform_1, window_bounds = array<i64: 1, 128, 4>}, {transform_indices = @transform_2, window_bounds = array<i64: 1, 16, 256>}, {transform_indices = @transform_3, window_bounds = array<i64: 1, 128, 256>}, {transform_indices = @transform_4, window_bounds = array<i64: 1, 16, 128>}]} {
    %c0_i32 = arith.constant 0 : i32
    %0 = arith.cmpi eq, %arg1, %c0_i32 : i32
    %1 = arith.extui %0 : i1 to i32
    %c0_i32_0 = arith.constant 0 : i32
    %2 = arith.cmpi ne, %1, %c0_i32_0 : i32
    scf.if %2 {
      %cst_13 = arith.constant 0.000000e+00 : f32
      %22 = vector.broadcast %cst_13 : f32 to vector<16x128xf32>
      %c0_14 = arith.constant 0 : index
      %c0_15 = arith.constant 0 : index
      %23 = vector.load %arg7[%c0_14, %c0_15] : memref<16x128xf32, #tpu.memory_space<vmem>>, vector<16x128xf32>
      tpu.vector_store %arg7[%c0_14, %c0_15], %22 {strides = array<i32>} : memref<16x128xf32, #tpu.memory_space<vmem>>, vector<16x128xf32>,
    } else {
    }
    %c0 = arith.constant 0 : index
    %c0_1 = arith.constant 0 : index
    %c0_2 = arith.constant 0 : index
    %3 = vector.load %arg4[%c0, %c0_1, %c0_2] : memref<1x16x256xbf16, #tpu.memory_space<vmem>>, vector<1x16x256xbf16>
    %4 = vector.shape_cast %3 : vector<1x16x256xbf16> to vector<16x256xbf16>
    %5 = arith.extf %4 : vector<16x256xbf16> to vector<16x256xf32>
    %6 = arith.negf %5 : vector<16x256xf32>
    %7 = math.exp %6 : vector<16x256xf32>
    %cst = arith.constant 1.000000e+00 : f32
    %8 = vector.broadcast %cst : f32 to vector<16x256xf32>
    %9 = arith.addf %8, %7 : vector<16x256xf32>
    %10 = arith.divf %8, %9 : vector<16x256xf32>
    %11 = arith.truncf %10 : vector<16x256xf32> to vector<16x256xbf16>
    %c0_3 = arith.constant 0 : index
    %c0_4 = arith.constant 0 : index
    %c0_5 = arith.constant 0 : index
    %12 = vector.load %arg5[%c0_3, %c0_4, %c0_5] : memref<1x128x256xi8, #tpu.memory_space<vmem>>, vector<1x128x256xi8>
    %13 = vector.shape_cast %12 : vector<1x128x256xi8> to vector<128x256xi8>
    %14 = arith.sitofp %13 : vector<128x256xi8> to vector<128x256xbf16>
    %c0_6 = arith.constant 0 : index
    %c0_7 = arith.constant 0 : index
    %15 = vector.load %arg7[%c0_6, %c0_7] : memref<16x128xf32, #tpu.memory_space<vmem>>, vector<16x128xf32>
    %cst_8 = arith.constant dense<0.000000e+00> : vector<16x128xf32>
    %16 = tpu.matmul %11, %14, %cst_8 {dimension_numbers = #tpu.dot_dimension_numbers<[1], [1], [0], [0], [0, 0, 1, 0], [], []>} : vector<16x256xbf16>, vector<128x256xbf16>, vector<16x128xf32> -> vector<16x128xf32>
    %17 = arith.addf %15, %16 : vector<16x128xf32>
    %c0_9 = arith.constant 0 : index
    %c0_10 = arith.constant 0 : index
    %18 = vector.load %arg7[%c0_9, %c0_10] : memref<16x128xf32, #tpu.memory_space<vmem>>, vector<16x128xf32>
    tpu.vector_store %arg7[%c0_9, %c0_10], %17 {strides = array<i32>} : memref<16x128xf32, #tpu.memory_space<vmem>>, vector<16x128xf32>,
    %c0_i32_11 = arith.constant 0 : i32
    %19 = arith.cmpi eq, %arg1, %c0_i32_11 : i32
    %20 = arith.extui %19 : i1 to i32
    %c0_i32_12 = arith.constant 0 : i32
    %21 = arith.cmpi ne, %20, %c0_i32_12 : i32
    scf.if %21 {
      %c0_13 = arith.constant 0 : index
      %c0_14 = arith.constant 0 : index
      %22 = vector.load %arg7[%c0_13, %c0_14] : memref<16x128xf32, #tpu.memory_space<vmem>>, vector<16x128xf32>
      %23 = vector.extract_strided_slice %22 {offsets = [0, 5], sizes = [16, 1], strides = [1, 1]} : vector<16x128xf32> to vector<16x1xf32>
      %24 = vector.extract_strided_slice %22 {offsets = [8, 0], sizes = [1, 128], strides = [1, 1]} : vector<16x128xf32> to vector<1x128xf32>
      %cst_15 = arith.constant 2.000000e+00 : f32
      %25 = vector.broadcast %cst_15 : f32 to vector<16x128xf32>
      %26 = arith.mulf %25, %22 : vector<16x128xf32>
      %27 = vector.broadcast %23 : vector<16x1xf32> to vector<16x128xf32>
      %28 = arith.subf %26, %27 : vector<16x128xf32>
      %29 = vector.broadcast %24 : vector<1x128xf32> to vector<16x128xf32>
      %30 = arith.subf %28, %29 : vector<16x128xf32>
      %cst_16 = arith.constant 2.560000e+02 : f32
      %31 = vector.broadcast %cst_16 : f32 to vector<16x128xf32>
      %32 = arith.addf %30, %31 : vector<16x128xf32>
      %cst_17 = arith.constant 0.000000e+00 : f32
      %33 = vector.broadcast %cst_17 : f32 to vector<16x128xf32>
      %34 = arith.subf %33, %32 : vector<16x128xf32>
      %cst_18 = arith.constant 3.906250e-03 : f32
      %35 = vector.broadcast %cst_18 : f32 to vector<16x128xf32>
      %36 = arith.mulf %34, %35 : vector<16x128xf32>
      %cst_19 = arith.constant 2.000000e+00 : f32
      %37 = vector.broadcast %cst_19 : f32 to vector<16x128xf32>
      %38 = arith.mulf %37, %22 : vector<16x128xf32>
      %cst_20 = arith.constant 1.000000e+00 : f32
      %39 = vector.broadcast %cst_20 : f32 to vector<16x128xf32>
      %40 = arith.addf %38, %39 : vector<16x128xf32>
      %41 = vector.broadcast %23 : vector<16x1xf32> to vector<16x128xf32>
      %42 = vector.broadcast %24 : vector<1x128xf32> to vector<16x128xf32>
      %43 = arith.addf %41, %42 : vector<16x128xf32>
      %cst_21 = arith.constant 1.000000e+00 : f32
      %44 = vector.broadcast %cst_21 : f32 to vector<16x128xf32>
      %45 = arith.addf %43, %44 : vector<16x128xf32>
      %46 = arith.divf %40, %45 : vector<16x128xf32>
      %cst_22 = arith.constant 1.000000e+00 : f32
      %47 = vector.broadcast %cst_22 : f32 to vector<16x128xf32>
      %48 = arith.subf %47, %46 : vector<16x128xf32>
      %c0_23 = arith.constant 0 : index
      %c0_24 = arith.constant 0 : index
      %c0_25 = arith.constant 0 : index
      %49 = vector.load %arg2[%c0_23, %c0_24, %c0_25] : memref<1x16x4xf32, #tpu.memory_space<vmem>>, vector<1x16x4xf32>
      %50 = vector.shape_cast %49 : vector<1x16x4xf32> to vector<16x4xf32>
      %c0_26 = arith.constant 0 : index
      %c0_27 = arith.constant 0 : index
      %c0_28 = arith.constant 0 : index
      %51 = vector.load %arg3[%c0_26, %c0_27, %c0_28] : memref<1x128x4xf32, #tpu.memory_space<vmem>>, vector<1x128x4xf32>
      %52 = vector.shape_cast %51 : vector<1x128x4xf32> to vector<128x4xf32>
      %cst_29 = arith.constant dense<0.000000e+00> : vector<16x128xf32>
      %53 = tpu.matmul %50, %52, %cst_29 {dimension_numbers = #tpu.dot_dimension_numbers<[1], [1], [0], [0], [0, 0, 1, 0], [], []>} : vector<16x4xf32>, vector<128x4xf32>, vector<16x128xf32> -> vector<16x128xf32>
      %cst_30 = arith.constant 0.000000e+00 : f32
      %54 = vector.broadcast %cst_30 : f32 to vector<16x128xf32>
      %55 = arith.subf %54, %53 : vector<16x128xf32>
      %cst_31 = arith.constant 1.000000e+00 : f32
      %56 = vector.broadcast %cst_31 : f32 to vector<16x128xf32>
      %57 = arith.mulf %56, %55 : vector<16x128xf32>
      %cst_32 = arith.constant 1.000000e+00 : f32
      %58 = vector.broadcast %cst_32 : f32 to vector<16x128xf32>
      %59 = arith.mulf %58, %36 : vector<16x128xf32>
      %60 = arith.addf %57, %59 : vector<16x128xf32>
      %cst_33 = arith.constant 1.000000e+00 : f32
      %61 = vector.broadcast %cst_33 : f32 to vector<16x128xf32>
      %62 = arith.mulf %61, %48 : vector<16x128xf32>
      %63 = arith.addf %60, %62 : vector<16x128xf32>
      %c0_34 = arith.constant 0 : index
      %c0_35 = arith.constant 0 : index
      %c0_36 = arith.constant 0 : index
      %64 = vector.load %arg6[%c0_34, %c0_35, %c0_36] : memref<1x16x128xf32, #tpu.memory_space<vmem>>, vector<1x16x128xf32>
      %65 = vector.shape_cast %64 : vector<1x16x128xf32> to vector<16x128xf32>
      %66 = vector.shape_cast %63 : vector<16x128xf32> to vector<1x16x128xf32>
      tpu.vector_store %arg6[%c0_34, %c0_35, %c0_36], %66 {strides = array<i32>} : memref<1x16x128xf32, #tpu.memory_space<vmem>>, vector<1x16x128xf32>,
    } else {
    }
    return
  }
  func.func @transform_0(%arg0: i32, %arg1: i32) -> (i32, i32, i32) {
    %c0_i32 = arith.constant 0 : i32
    %c0_i32_0 = arith.constant 0 : i32
    %c0_i32_1 = arith.constant 0 : i32
    return %arg0, %c0_i32, %c0_i32_0 : i32, i32, i32
  }
  func.func @transform_1(%arg0: i32, %arg1: i32) -> (i32, i32, i32) {
    %c0_i32 = arith.constant 0 : i32
    %c0_i32_0 = arith.constant 0 : i32
    %c0_i32_1 = arith.constant 0 : i32
    return %arg0, %c0_i32, %c0_i32_0 : i32, i32, i32
  }
  func.func @transform_2(%arg0: i32, %arg1: i32) -> (i32, i32, i32) {
    %c0_i32 = arith.constant 0 : i32
    %c0_i32_0 = arith.constant 0 : i32
    return %arg0, %c0_i32, %arg1 : i32, i32, i32
  }
  func.func @transform_3(%arg0: i32, %arg1: i32) -> (i32, i32, i32) {
    %c0_i32 = arith.constant 0 : i32
    %c0_i32_0 = arith.constant 0 : i32
    return %arg0, %c0_i32, %arg1 : i32, i32, i32
  }
  func.func @transform_4(%arg0: i32, %arg1: i32) -> (i32, i32, i32) {
    %c0_i32 = arith.constant 0 : i32
    %c0_i32_0 = arith.constant 0 : i32
    %c0_i32_1 = arith.constant 0 : i32
    return %arg0, %c0_i32, %c0_i32_0 : i32, i32, i32
  }
}

</mosaic_0001>

<bundles_post_ra>
// kernel: tpu_custom_call.1
= control target key start
LH: loop header
LB: loop body
LE: loop exit
PB: predicated region body
PF: predicated region fallthrough
CT: control target
= control target key end

     0   :  { %9 = vsyncpa [#allocation4], 0  ;;  %s1306_s0 = inlined_call_operand.vmem [shape: f32[2,16,4], index: 0, kind: input, shape index: {}]   ;;  %s1307_s1 = inlined_call_operand.vmem [shape: f32[2,128,4], index: 1, kind: input, shape index: {}]   ;;  %s1308_s2 = inlined_call_operand.vmem [shape: bf16[2,16,256], index: 2, kind: input, shape index: {}]   ;;  %s1309_s3 = inlined_call_operand.vmem [shape: s8[2,128,256], index: 3, kind: input, shape index: {}]   ;;  %s1310_s4 = inlined_call_operand.hbm [shape: f32[2,16,128], index: 4, kind: output, shape index: {}]  }
   0x1   :  { %11 = vsyncpa [#allocation4 + $0x1], 0  ;;  %s1049_s15 = smov 0   ;;  %s1051_s16 = smov 0  }
   0x2   :  { %s1053_s17 = smov 0   ;;  %s1055_s18 = smov 0  }
   0x3   :  { %s1057_s19 = smov 0   ;;  %s1059_s20 = smov 0  }
   0x4 LB: > { %s816_s21 = sadd.s32 4294967295, %s1019_s20   ;;  %s817_s22 = sadd.s32 4294967294, %s1019_s20   ;;  %s1019_s20 = sphi %s1059_s20, %s17_s20   ;;  %s1015_s19 = sphi %s1057_s19, %s1325_s19   ;;  %s1011_s18 = sphi %s1055_s18, %s1324_s18   ;;  %s1007_s17 = sphi %s1053_s17, %s1323_s17   ;;  %s1003_s16 = sphi %s1051_s16, %s1322_s16   ;;  %s999_s15 = sphi %s1049_s15, %s1321_s15  }
   0x5   : > { %s29_s23 = sadd.s32 1, %s1015_s19  ;;  %s144_s24 = sadd.s32 1, %s1007_s17 }
   0x6   : > { %p31_p0 = scmp.ge.s32.totalorder %s29_s23, 2  ;;  %p154_p1 = scmp.ne.s32.totalorder %s1007_s17, %s1003_s16 }
   0x7   : > { %p155_p2 = scmp.eq.s32.totalorder %s816_s21, 1  ;;  %p160_p3 = scmp.ne.s32.totalorder %s1003_s16, %s999_s15 }
   0x8   : > { %s1327_s23 = smov (%p31_p0, %s29_s23), 0  ;;  %p161_p5 = scmp.eq.s32.totalorder %s817_s22, 1 }
   0x9   : > { %p1089_p4 = por %p155_p2, %p154_p1  ;;  %s141_s26 = ssub.s32 %s1015_s19, %s1327_s23 }
   0xa   : > { %p820_p6 = scmp.ge.s32.totalorder %s1019_s20, 1  ;;  %p142_p7 = scmp.eq.s32.totalorder %s141_s26, 0 }
   0xb   : > { %p1096_p8 = por %p161_p5, %p160_p3  ;;  %p221_p9 = scmp.lt.s32.totalorder %s1019_s20, 3 }
   0xc   : > { %s1102_s28 = scalar_select %p142_p7, %s1007_s17, %s144_s24  }
   0xd   : > { %p222_p10 = pnand %p820_p6, %p221_p9 }
   0xe   : > { %p270_p11 = scmp.lt.s32.totalorder (!%p222_p10), %s1011_s18, 1  ;;  %s861_s5 = sshll.u32 (!%p222_p10), %s1011_s18, 4 }
   0xf   : > { %225 = sbr.rel (%p222_p10) target bundleno = 376 (0x178), region = 36  ;;  %s694_s9 = scalar_lea.hbm (!%p222_p10), %s1310_s4, %s861_s5 }
  0x10   : > { %s697_s10 = sshll.u32 (!%p222_p10), %s694_s9, 4  ;;  %s961_s22 = scalar_lea.hbm (!%p222_p10), %s1310_s4, 32  ;;  %s698_s10 = int_to_ptr.hbm [resolvable:$true] %s697_s10 }
  0x14   : > { %s1106_s29 = scalar_select %p270_p11, %s1011_s18, 1  ;;  %vm596_vm0 = vcmask 31744  }
  0x16   : > { %s860_s30 = sshll.u32 %s1106_s29, 6  ;;  %s857_s8 = sshll.u32 %s1106_s29, 4 }
  0x17   : > { %s1112_s7 = scalar_lea.vmem %s1309_s3, %s860_s30  ;;  %s288_s11 = scalar_lea.vmem %s1308_s2, %s857_s8 }
  0x18   : > { %v396_v0 = vld [vmem:[%s1112_s7 + $0x30] sm:$0xff]  ;;  %v397_v1 = vld [vmem:[%s1112_s7 + $0x38] sm:$0xff]  ;;  %v394_v20 = vld [vmem:[%s1112_s7 + $0x20] sm:$0xff]  ;;  %s858_s12 = sshll.u32 %s1106_s29, 7  ;;  %s274_s26 = scalar_lea.vmem %s1306_s0, %s857_s8 }
  0x19   : > { %v426_v2 = vunpack.c.2.s8 %v396_v0  ;;  %v428_v3 = vunpack.c.3.s8 %v396_v0  ;;  %v427_v4 = vunpack.c.2.s8 %v397_v1  ;;  %v429_v5 = vunpack.c.3.s8 %v397_v1  ;;  %v395_v21 = vld [vmem:[%s1112_s7 + $0x28] sm:$0xff]  ;;  %v306_v28 = vld [vmem:[%s288_s11] sm:$0xff]  ;;  %v392_v52 = vld [vmem:[%s1112_s7 + $0x10] sm:$0xff]  ;;  %s1141_s21 = scalar_lea.vmem %s1307_s1, %s858_s12  ;;  %s267_s29 = sand.u32 1, %s1003_s16  }
  0x1a   : > { %v422_v6 = vunpack.c.0.s8 %v396_v0  ;;  %v424_v7 = vunpack.c.1.s8 %v396_v0  ;;  %v423_v8 = vunpack.c.0.s8 %v397_v1  ;;  %v425_v9 = vunpack.c.1.s8 %v397_v1  ;;  %v307_v29 = vld [vmem:[%s288_s11 + $0x8] sm:$0xff]  ;;  %v393_v53 = vld [vmem:[%s1112_s7 + $0x18] sm:$0xff]  ;;  %s821_s30 = sshll.u32 %s267_s29, 4  ;;  %s683_s11 = scalar_lea.sflag [#allocation4], %s267_s29 }
  0x1b   : > { %v458_v10 = vcvt.s32.f32 %v426_v2  ;;  %v460_v11 = vcvt.s32.f32 %v428_v3  ;;  %v459_v12 = vcvt.s32.f32 %v427_v4  ;;  %v461_v13 = vcvt.s32.f32 %v429_v5  ;;  %s269_s6 = scalar_lea.vmem [#allocation3], %s821_s30  ;;  %s955_s12 = sshra.s32 %s698_s10, 4  ;;  %s956_s12 = int_to_ptr.hbm [resolvable:$true] %s955_s12 }
  0x1c   : > { %v454_v16 = vcvt.s32.f32 %v422_v6  ;;  %v456_v17 = vcvt.s32.f32 %v424_v7  ;;  %v455_v18 = vcvt.s32.f32 %v423_v8  ;;  %v457_v19 = vcvt.s32.f32 %v425_v9  ;;  %s695_s18 = sshll.u32 %s269_s6, 4  ;;  %s957_s13 = scalar_lea.hbm %s956_s12, 16  ;;  %s696_s18 = int_to_ptr.vmem [resolvable:$true] %s695_s18 }
  0x1d   : > { %v476_v14 = vpack.c.bf16 %v460_v11, %v458_v10  ;;  %v477_v15 = vpack.c.bf16 %v461_v13, %v459_v12  ;;  %v418_v22 = vunpack.c.2.s8 %v394_v20  ;;  %v420_v23 = vunpack.c.3.s8 %v394_v20  ;;  %p958_p12 = scmp.ne.s32.totalorder %s956_s12, %s957_s13  ;;  %p962_p1 = scmp.lt.s32.totalorder %s956_s12, %s1310_s4 }
  0x1e   : > { %v474_v24 = vpack.c.bf16 %v456_v17, %v454_v16  ;;  %v475_v25 = vpack.c.bf16 %v457_v19, %v455_v18  ;;  %v419_v26 = vunpack.c.2.s8 %v395_v21  ;;  %v421_v27 = vunpack.c.3.s8 %v395_v21  ;;  %v391_v16 = vld [vmem:[%s1112_s7 + $0x8] sm:$0xff]  ;;  %v595_v17 = vld [vmem:[%s1141_s21 + $0x78] sm:$0xff]  ;;  %p963_p2 = scmp.lt.s32.totalorder %s961_s22, %s957_s13 }
  0x1f   : > { %480 = vmatpush.bf16.xpose.msra.mxu0 %v476_v14  ;;  %494 = vmatpush.bf16.xpose.msra.mxu1 %v477_v15  ;;  %v450_v30 = vcvt.s32.f32 %v418_v22  ;;  %v308_v31 = vunpack.c.l.bf16 %v306_v28  ;;  %v452_v32 = vcvt.s32.f32 %v420_v23  ;;  %v310_v35 = vunpack.c.l.bf16 %v307_v29  ;;  %v390_v15 = vld [vmem:[%s1112_s7] sm:$0xff]  ;;  %p959_p13 = pnand %p958_p12, %p1089_p4 }
  0x20   : > { %v451_v33 = vcvt.s32.f32 %v419_v26  ;;  %v453_v34 = vcvt.s32.f32 %v421_v27  ;;  %v414_v37 = vunpack.c.0.s8 %v394_v20  ;;  %v416_v39 = vunpack.c.1.s8 %v394_v20  ;;  %834 = vmatpush.xpose.msk.msra.mxu2 %vm596_vm0, %v595_v17  ;;  %p964_p3 = por %p963_p2, %p962_p1 }
  0x21   : > { %v830_v36 = vmul.f32 -1.442695, %v308_v31  ;;  %v832_v38 = vmul.f32 -1.442695, %v310_v35  ;;  %v415_v40 = vunpack.c.0.s8 %v395_v21  ;;  %v417_v41 = vunpack.c.1.s8 %v395_v21  ;;  %p960_p0 = pneg %p959_p13 }
  0x22   : > { %v309_v42 = vunpack.c.h.bf16 %v306_v28  ;;  %v472_v43 = vpack.c.bf16 %v452_v32, %v450_v30  ;;  %v473_v44 = vpack.c.bf16 %v453_v34, %v451_v33  ;;  %v311_v45 = vunpack.c.h.bf16 %v307_v29  ;;  %v594_v29 = vld [vmem:[%s1141_s21 + $0x70] sm:$0xff] }
  0x23   : > { %921 = vpow2.f32 %v830_v36  ;;  %v446_v48 = vcvt.s32.f32 %v414_v37  ;;  %v448_v49 = vcvt.s32.f32 %v416_v39  ;;  %v447_v50 = vcvt.s32.f32 %v415_v40  ;;  %v593_v40 = vld [vmem:[%s1141_s21 + $0x68] sm:$0xff]  ;;  %p965_p5 = pnand %p964_p3, %p960_p0 }
  0x24   : > { %923 = vpow2.f32 %v832_v38  ;;  %v831_v46 = vmul.f32 -1.442695, %v309_v42  ;;  %v833_v47 = vmul.f32 -1.442695, %v311_v45  ;;  %v449_v51 = vcvt.s32.f32 %v417_v41  ;;  %835 = vmatpush.xpose.msk.msra.mxu2 %vm596_vm0, %v594_v29 }
  0x25   : > { %v410_v56 = vunpack.c.2.s8 %v392_v52  ;;  %v412_v57 = vunpack.c.3.s8 %v392_v52  ;;  %v470_v58 = vpack.c.bf16 %v448_v49, %v446_v48  ;;  %v411_v60 = vunpack.c.2.s8 %v393_v53 }
  0x26   : > { %925 = vpow2.f32 %v831_v46  ;;  %v471_v59 = vpack.c.bf16 %v449_v51, %v447_v50  ;;  %v413_v61 = vunpack.c.3.s8 %v393_v53  ;;  %v406_v8 = vunpack.c.0.s8 %v392_v52  ;;  %v592_v51 = vld [vmem:[%s1141_s21 + $0x60] sm:$0xff] }
  0x27   : > { %481 = vmatpush.bf16.xpose.msra.mxu0 %v474_v24  ;;  %495 = vmatpush.bf16.xpose.msra.mxu1 %v475_v25  ;;  %927 = vpow2.f32 %v833_v47  ;;  %v442_v2 = vcvt.s32.f32 %v410_v56  ;;  %v444_v4 = vcvt.s32.f32 %v412_v57  ;;  %v443_v5 = vcvt.s32.f32 %v411_v60 }
  0x28   : > { %v445_v6 = vcvt.s32.f32 %v413_v61  ;;  %v408_v9 = vunpack.c.1.s8 %v392_v52  ;;  %v407_v10 = vunpack.c.0.s8 %v393_v53  ;;  %v409_v13 = vunpack.c.1.s8 %v393_v53  ;;  %836 = vmatpush.xpose.msk.msra.mxu2 %vm596_vm0, %v593_v40  ;;  %v578_v40 = vld [vmem:[%s274_s26] sm:$0xff] }
  0x29   : > { %v922_v54 = vpop.eup %921  ;;  %v468_v11 = vpack.c.bf16 %v444_v4, %v442_v2  ;;  %v438_v19 = vcvt.s32.f32 %v406_v8  ;;  %v402_v25 = vunpack.c.2.s8 %v390_v15  ;;  %v404_v26 = vunpack.c.3.s8 %v390_v15 }
  0x2a   : > { %v924_v55 = vpop.eup %923  ;;  %v1126_v63 = vadd.f32 1.0, %v922_v54  ;;  %v469_v12 = vpack.c.bf16 %v445_v6, %v443_v5  ;;  %v440_v20 = vcvt.s32.f32 %v408_v9  ;;  %v439_v21 = vcvt.s32.f32 %v407_v10 }
  0x2b   : > { %v1128_v1 = vadd.f32 1.0, %v924_v55  ;;  %v441_v22 = vcvt.s32.f32 %v409_v13  ;;  %v403_v27 = vunpack.c.2.s8 %v391_v16  ;;  %v405_v28 = vunpack.c.3.s8 %v391_v16 }
  0x2c   : > { %v926_v62 = vpop.eup %925  ;;  %929 = vrcp.f32 %v1126_v63  ;;  %v466_v30 = vpack.c.bf16 %v440_v20, %v438_v19  ;;  %v434_v36 = vcvt.s32.f32 %v402_v25  ;;  %v436_v37 = vcvt.s32.f32 %v404_v26  ;;  %837 = vmatpush.xpose.msk.msra.mxu2 %vm596_vm0, %v592_v51 }
  0x2d   : > { %v928_v0 = vpop.eup %927  ;;  %v1130_v3 = vadd.f32 1.0, %v926_v62  ;;  %931 = vrcp.f32 %v1128_v1  ;;  %v467_v31 = vpack.c.bf16 %v441_v22, %v439_v21  ;;  %v435_v38 = vcvt.s32.f32 %v403_v27  ;;  %v591_v62 = vld [vmem:[%s1141_s21 + $0x58] sm:$0xff] }
  0x2e   : > { %v1132_v7 = vadd.f32 1.0, %v928_v0  ;;  %v437_v39 = vcvt.s32.f32 %v405_v28  ;;  %v398_v41 = vunpack.c.0.s8 %v390_v15  ;;  %v400_v42 = vunpack.c.1.s8 %v390_v15 }
  0x2f   : > { %482 = vmatpush.bf16.xpose.msra.mxu0 %v472_v43  ;;  %496 = vmatpush.bf16.xpose.msra.mxu1 %v473_v44  ;;  %933 = vrcp.f32 %v1130_v3  ;;  %v399_v43 = vunpack.c.0.s8 %v391_v16  ;;  %v401_v44 = vunpack.c.1.s8 %v391_v16  ;;  %v464_v49 = vpack.c.bf16 %v436_v37, %v434_v36  ;;  %v583_v36 = vld [vmem:[%s1141_s21 + $0x18] sm:$0xff]  ;;  %v582_v37 = vld [vmem:[%s1141_s21 + $0x10] sm:$0xff] }
  0x30   : > { %935 = vrcp.f32 %v1132_v7  ;;  %v465_v50 = vpack.c.bf16 %v437_v39, %v435_v38  ;;  %v430_v52 = vcvt.s32.f32 %v398_v41  ;;  %v432_v53 = vcvt.s32.f32 %v400_v42  ;;  %838 = vmatpush.xpose.msk.msra.mxu2 %vm596_vm0, %v591_v62  ;;  %v581_v38 = vld [vmem:[%s1141_s21 + $0x8] sm:$0xff]  ;;  %v580_v39 = vld [vmem:[%s1141_s21] sm:$0xff] }
  0x31   : > { %v431_v54 = vcvt.s32.f32 %v399_v43  ;;  %v433_v55 = vcvt.s32.f32 %v401_v44  ;;  %vm333_vm1 = vweird.f32 %v1126_v63  ;;  %vm363_vm3 = vweird.f32 %v1128_v1  ;;  %v579_v41 = vld [vmem:[%s274_s26 + $0x8] sm:$0xff] }
  0x32   : > { %v1144_v14 = vpop.eup %929  ;;  %v337_v60 = vand.u32 2147483647, %v1126_v63  ;;  %v339_v61 = vand.u32 2147483648, %v1126_v63  ;;  %vm348_vm5 = vweird.f32 %v1130_v3  ;;  %v367_v2 = vand.u32 2147483647, %v1128_v1 }
  0x33   : > { %v1149_v18 = vpop.eup %931  ;;  %v329_v32 = vmul.f32 %v1144_v14, %v1126_v63  ;;  %vm334_vm2 = vweird.f32 %v1144_v14  ;;  %v369_v4 = vand.u32 2147483648, %v1128_v1  ;;  %vm378_vm8 = vweird.f32 %v1132_v7 }
  0x34   : > { %v359_v33 = vmul.f32 %v1149_v18, %v1128_v1  ;;  %vm364_vm4 = vweird.f32 %v1149_v18  ;;  %vm1183_vm7 = vmor %vm333_vm1, %vm334_vm2  ;;  %v352_v6 = vand.u32 2147483647, %v1130_v3  ;;  %v354_v8 = vand.u32 2147483648, %v1130_v3 }
  0x35   : > { %v1151_v23 = vpop.eup %933  ;;  %v330_v45 = vsub.f32 1.0, %v329_v32  ;;  %vm1196_vm10 = vmor %vm363_vm3, %vm364_vm4  ;;  %v384_v9 = vand.u32 2147483648, %v1132_v7  ;;  %v382_v13 = vand.u32 2147483647, %v1132_v7  ;;  %v462_v15 = vpack.c.bf16 %v432_v53, %v430_v52  ;;  %v587_v32 = vld [vmem:[%s1141_s21 + $0x38] sm:$0xff] }
  0x36   : > { %v1154_v24 = vpop.eup %935  ;;  %v344_v34 = vmul.f32 %v1151_v23, %v1130_v3  ;;  %v360_v46 = vsub.f32 1.0, %v359_v33  ;;  %vm349_vm6 = vweird.f32 %v1151_v23  ;;  %v463_v16 = vpack.c.bf16 %v433_v55, %v431_v54  ;;  %v590_v3 = vld [vmem:[%s1141_s21 + $0x50] sm:$0xff] }
  0x37   : > { %483 = vmatpush.bf16.xpose.msra.mxu0 %v470_v58  ;;  %497 = vmatpush.bf16.xpose.msra.mxu1 %v471_v59  ;;  %v374_v35 = vmul.f32 %v1154_v24, %v1132_v7  ;;  %v331_v56 = vmul.f32 %v1144_v14, %v330_v45  ;;  %vm379_vm9 = vweird.f32 %v1154_v24  ;;  %vm1209_vm11 = vmor %vm348_vm5, %vm349_vm6  ;;  %vm338_vm13 = vcmp.eq.f32.partialorder %v337_v60, 8.507059e+37  ;;  %v586_v33 = vld [vmem:[%s1141_s21 + $0x30] sm:$0xff] }
  0x38   : > { %v345_v47 = vsub.f32 1.0, %v344_v34  ;;  %v361_v57 = vmul.f32 %v1149_v18, %v360_v46  ;;  %vm1220_vm12 = vmor %vm378_vm8, %vm379_vm9  ;;  %v340_v19 = vor.u32 1.1754944e-38, %v339_v61  ;;  %vm368_vm14 = vcmp.eq.f32.partialorder %v367_v2, 8.507059e+37  ;;  %839 = vmatpush.xpose.msk.msra.mxu2 %vm596_vm0, %v590_v3  ;;  %v585_v34 = vld [vmem:[%s1141_s21 + $0x28] sm:$0xff] }
  0x39   : > { %v375_v48 = vsub.f32 1.0, %v374_v35  ;;  %v332_v63 = vadd.f32 %v1144_v14, %v331_v56  ;;  %v370_v20 = vor.u32 1.1754944e-38, %v369_v4  ;;  %vm353_vm15 = vcmp.eq.f32.partialorder %v352_v6, 8.507059e+37  ;;  %v584_v35 = vld [vmem:[%s1141_s21 + $0x20] sm:$0xff] }
  0x3a   : > { %v346_v58 = vmul.f32 %v1151_v23, %v345_v47  ;;  %v362_v10 = vadd.f32 %v1149_v18, %v361_v57  ;;  %v355_v22 = vor.u32 1.1754944e-38, %v354_v8  ;;  %v385_v25 = vor.u32 1.1754944e-38, %v384_v9 }
  0x3b   : > { %v376_v59 = vmul.f32 %v1154_v24, %v375_v48  ;;  %v336_v21 = vsel %vm1183_vm7, %v1144_v14, %v332_v63  ;;  %vm383_vm1 = vcmp.eq.f32.partialorder %v382_v13, 8.507059e+37  ;;  %v589_v14 = vld [vmem:[%s1141_s21 + $0x48] sm:$0xff]  ;;  %v1021_v42 = vmov 5  }
  0x3c   : > { %v366_v7 = vsel %vm1196_vm10, %v1149_v18, %v362_v10  ;;  %v341_v28 = vsel %vm338_vm13, %v340_v19, %v336_v21  ;;  %840 = vmatpush.xpose.msk.msra.mxu2 %vm596_vm0, %v589_v14  ;;  %920 = vset.pattern.permute.xlu0 %v1021_v42 }
  0x3d   : > { %v371_v29 = vsel %vm368_vm14, %v370_v20, %v366_v7 }
  0x3f   : > { %484 = vmatpush.bf16.xpose.msra.mxu0 %v468_v11  ;;  %498 = vmatpush.bf16.xpose.msra.mxu1 %v469_v12  ;;  %v347_v11 = vadd.f32 %v1151_v23, %v346_v58  ;;  %v377_v12 = vadd.f32 %v1154_v24, %v376_v59 }
  0x41   : > { %v351_v26 = vsel %vm1209_vm11, %v1151_v23, %v347_v11  ;;  %v381_v27 = vsel %vm1220_vm12, %v1154_v24, %v377_v12  ;;  %v588_v23 = vld [vmem:[%s1141_s21 + $0x40] sm:$0xff] }
  0x42   : > { %v356_v18 = vsel %vm353_vm15, %v355_v22, %v351_v26  ;;  %841 = vmatpush.xpose.msk.msra.mxu2 %vm596_vm0, %v588_v23 }
  0x46   : > { %842 = vmatpush.xpose.msk.msra.mxu2 %vm596_vm0, %v587_v32 }
  0x47   : > { %485 = vmatpush.bf16.xpose.msra.mxu0 %v466_v30  ;;  %499 = vmatpush.bf16.xpose.msra.mxu1 %v467_v31  ;;  %v386_v30 = vsel %vm383_vm1, %v385_v25, %v381_v27  ;;  %v388_v31 = vpack.c.bf16 %v371_v29, %v341_v28 }
  0x48   : > { %v389_v24 = vpack.c.bf16 %v386_v30, %v356_v18 }
  0x4a   : > { %843 = vmatpush.xpose.msk.msra.mxu2 %vm596_vm0, %v586_v33 }
  0x4e   : > { %844 = vmatpush.xpose.msk.msra.mxu2 %vm596_vm0, %v585_v34 }
  0x4f   : > { %486 = vmatpush.bf16.xpose.msra.mxu0 %v464_v49  ;;  %500 = vmatpush.bf16.xpose.msra.mxu1 %v465_v50 }
  0x52   : > { %845 = vmatpush.xpose.msk.msra.mxu2 %vm596_vm0, %v584_v35 }
  0x56   : > { %846 = vmatpush.xpose.msk.msra.mxu2 %vm596_vm0, %v583_v36 }
  0x57   : > { %487 = vmatpush.bf16.xpose.msra.mxu0 %v462_v15  ;;  %501 = vmatpush.bf16.xpose.msra.mxu1 %v463_v16 }
  0x5a   : > { %847 = vmatpush.xpose.msk.msra.mxu2 %vm596_vm0, %v582_v37 }
  0x5e   : > { %488 = vmatmul.bf16.vlgmr.msra.gmra.mxu0 %v388_v31  ;;  %502 = vmatmul.bf16.vlgmr.msra.gmra.mxu1 %v389_v24 }
  0x5f   : > { %848 = vmatpush.xpose.msk.msra.mxu2 %vm596_vm0, %v581_v38 }
  0x63   : > { %849 = vmatpush.xpose.msk.msra.mxu2 %vm596_vm0, %v580_v39 }
  0x66   : > { %850 = vmatmul.msk.f32.vlgmr.msra.gmra.mxu2 %vm596_vm0, %v578_v40 }
  0x6e   : > { %851 = vmatmul.msk.f32.gmra.mxu2 %vm596_vm0, %v579_v41 }
  0xdb   : > { %v489_v43 = vpop.f32.mrf.mxu0  ;;  %v503_v44 = vpop.f32.mrf.mxu1 }
  0xdc   : > { %v504_v45 = vadd.f32 %v503_v44, %v489_v43 }
  0xde   : > { %521 = vperm.xlu0 %920, %v504_v45   ;;  %v517_v49 = vmul.f32 2.0, %v504_v45 }
  0xe0   : > { %v540_v1 = vadd.f32 1.0, %v517_v49 }
  0xe3   : > { %v491_v46 = vpop.f32.mrf.mxu0  ;;  %v505_v47 = vpop.f32.mrf.mxu1 }
  0xe4   : > { %v506_v48 = vadd.f32 %v505_v47, %v491_v46 }
  0xe6   : > { %526 = vperm.xlu0 %920, %v506_v48   ;;  %v531_v50 = vperm.slane %v506_v48, 0  ;;  %v518_v58 = vmul.f32 2.0, %v506_v48 }
  0xe8   : > { %v541_v30 = vadd.f32 1.0, %v518_v58 }
  0xe9   : > { %v668_v5 = vpop.f32.mrf.mxu2 }
  0xea   : > { %v674_v15 = vsub.f32 0.0, %v668_v5 }
  0xf1   : > { %v671_v28 = vpop.f32.mrf.mxu2 }
  0xf2   : > { %v675_v32 = vsub.f32 0.0, %v671_v28 }
 0x150   : > { %v522_v51 = vpop.permute.xlu0 %521 }
 0x151   : > { %v529_v52 = vsub.f32 %v517_v49, %v522_v51  ;;  %v542_v53 = vadd.f32 %v531_v50, %v522_v51 }
 0x153   : > { %v532_v54 = vsub.f32 %v529_v52, %v531_v50  ;;  %v544_v55 = vadd.f32 1.0, %v542_v53 }
 0x155   : > { %937 = vrcp.f32 %v544_v55  ;;  %v534_v60 = vadd.f32 256.0, %v532_v54  ;;  %v557_v63 = vand.u32 2147483648, %v544_v55  ;;  %v555_v9 = vand.u32 2147483647, %v544_v55 }
 0x156   : > { %vm551_vm2 = vweird.f32 %v544_v55 }
 0x157   : > { %v536_v4 = vsub.f32 0.0, %v534_v60  ;;  %v558_v13 = vor.u32 1.1754944e-38, %v557_v63  ;;  %vm556_vm4 = vcmp.eq.f32.partialorder %v555_v9, 8.507059e+37 }
 0x158   : > { %v527_v56 = vpop.permute.xlu0 %526 }
 0x159   : > { %v543_v57 = vadd.f32 %v531_v50, %v527_v56  ;;  %v530_v0 = vsub.f32 %v518_v58, %v527_v56  ;;  %v538_v12 = vmul.f32 0.00390625, %v536_v4 }
 0x15b   : > { %v938_v59 = vpop.eup %937  ;;  %v545_v61 = vadd.f32 1.0, %v543_v57  ;;  %v533_v6 = vsub.f32 %v530_v0, %v531_v50  ;;  %v676_v22 = vadd.f32 %v674_v15, %v538_v12 }
 0x15c   : > { %v547_v62 = vmul.f32 %v938_v59, %v544_v55  ;;  %vm552_vm0 = vweird.f32 %v938_v59 }
 0x15d   : > { %939 = vrcp.f32 %v545_v61  ;;  %vm553_vm3 = vmor %vm551_vm2, %vm552_vm0  ;;  %v535_v16 = vadd.f32 256.0, %v533_v6  ;;  %v570_v25 = vand.u32 2147483647, %v545_v61  ;;  %v572_v7 = vand.u32 2147483648, %v545_v61 }
 0x15e   : > { %v548_v2 = vsub.f32 1.0, %v547_v62  ;;  %vm566_vm6 = vweird.f32 %v545_v61 }
 0x15f   : > { %v537_v26 = vsub.f32 0.0, %v535_v16  ;;  %v573_v23 = vor.u32 1.1754944e-38, %v572_v7  ;;  %vm571_vm8 = vcmp.eq.f32.partialorder %v570_v25, 8.507059e+37 }
 0x160   : > { %v549_v8 = vmul.f32 %v938_v59, %v548_v2 }
 0x161   : > { %v539_v31 = vmul.f32 0.00390625, %v537_v26 }
 0x162   : > { %v550_v10 = vadd.f32 %v938_v59, %v549_v8 }
 0x163   : > { %v940_v11 = vpop.eup %939  ;;  %v677_v36 = vadd.f32 %v675_v32, %v539_v31 }
 0x164   : > { %v562_v17 = vmul.f32 %v940_v11, %v545_v61  ;;  %v554_v3 = vsel %vm553_vm3, %v938_v59, %v550_v10  ;;  %vm567_vm5 = vweird.f32 %v940_v11 }
 0x165   : > { %v559_v19 = vsel %vm556_vm4, %v558_v13, %v554_v3  ;;  %vm568_vm7 = vmor %vm566_vm6, %vm567_vm5 }
 0x166   : > { %v563_v20 = vsub.f32 1.0, %v562_v17  ;;  %v560_v21 = vmul.f32 %v559_v19, %v540_v1 }
 0x168   : > { %v576_v27 = vsub.f32 1.0, %v560_v21  ;;  %v564_v14 = vmul.f32 %v940_v11, %v563_v20 }
 0x16a   : > { %v678_v29 = vadd.f32 %v676_v22, %v576_v27  ;;  %v565_v18 = vadd.f32 %v940_v11, %v564_v14 }
 0x16c   : > { %680 = vst [vmem:[%s269_s6] sm:$0xff] %v678_v29  ;;  %v569_v24 = vsel %vm568_vm7, %v940_v11, %v565_v18 }
 0x16d   : > { %v574_v33 = vsel %vm571_vm8, %v573_v23, %v569_v24 }
 0x16e   : > { %v575_v34 = vmul.f32 %v574_v33, %v541_v30 }
 0x170   : > { %v577_v35 = vsub.f32 1.0, %v575_v34 }
 0x172   : > { %v679_v37 = vadd.f32 %v677_v36, %v577_v35 }
 0x174   : > { %681 = vst [vmem:[%s269_s6 + $0x8] sm:$0xff] %v679_v37 }
 0x175   : > { %968 = shalt.err (!%p965_p5)
}
 0x176   : > { %s1022_s29 = smov 128   ;;  %s1023_s30 = smov 8  }
 0x177   : > { %862 = dma.vmem_to_hbm [thread:$0]  (%p1089_p4), %s696_s18, 256, %s698_s10, %s683_s11, %s1022_s29, %s1022_s29, %s1023_s30  }
 0x178 PF: > { %p868_p6 = scmp.ge.s32.totalorder %s1019_s20, 2  ;;  %s712_s5 = sand.u32 1, %s999_s15  }
 0x179   : > { %s713_s6 = scalar_lea.sflag [#allocation4], %s712_s5 }
 0x17a   : > { %p865_p7 = pnand %p868_p6, %p1096_p8 }
 0x17c   : > { %p866_p9 = pneg %p865_p7 }
 0x17e   : > { %994 = dma.done.wait (%p866_p9), %s713_s6, 256  }
 0x17f   : > { %996 = vsyncadd (%p866_p9), %s713_s6, 4294967040  ;;  %s17_s20 = sadd.s32 1, %s1019_s20   ;;  %s1321_s15 = smov %s1003_s16 }
 0x180   : > { %p14_p10 = scmp.ge.s32.totalorder %s17_s20, 4   ;;  %s1322_s16 = smov %s1007_s17 }
 0x181   : > { %s1323_s17 = smov %s1102_s28  ;;  %s1324_s18 = smov %s1015_s19 }
 0x182   : > { %s1325_s19 = smov %s1327_s23  ;;  %16 = sbr.rel (!%p14_p10) target bundleno = 4 (0x4), region = 88 }
 0x187   :  { %719 = vsyncpa [#allocation4], 1 }
 0x188   :  { %721 = vsyncpa [#allocation4 + $0x1], 1 }

</bundles_post_ra>
